<compile_context>
chip_gen: v6e
topology: v6e:2x2x1
jax: 0.10.0
libtpu: 0.0.40
codegen_flags: <defaults>
</compile_context>

<pallas_src>
import functools

import jax
import jax.numpy as jnp
from jax.experimental import pallas as pl
from jax.experimental.pallas import tpu as pltpu

EPS = 1e-5                      # PyTorch BatchNorm1d default eps
VMEM_LIMIT = 32 * 1024 * 1024   # safe on v5e / v6e / v7x
FUSED_MAX_ROWS = 4096           # whole-problem-in-VMEM fused-path threshold


def _round_up(x, m):
    return (x + m - 1) // m * m


def _choose_tile(m, target=1024):
    """Row tile near `target`, keeping the padded tail small (<~1 tile)."""
    mp8 = _round_up(m, 8)
    if mp8 <= target:
        return mp8
    n_tiles = -(-m // target)
    return _round_up(-(-m // n_tiles), 8)


# ---------------------------------------------------------------------------
# Fused path: conv1x1 -> BN(batch stats) -> ReLU -> all-tap tconv matmul,
# one pallas_call, everything resident in VMEM (no y HBM round trip).
# ---------------------------------------------------------------------------
def _fused_kernel(x_ref, w1_ref, gamma_ref, beta_ref, w2_ref, z_ref, *, m_real):
    y = jnp.dot(x_ref[...], w1_ref[...], preferred_element_type=jnp.float32)
    # Padded rows of x are zero and there is no conv bias, so they contribute
    # exactly 0 to both sums; just divide by the real row count.
    inv_m = 1.0 / m_real
    mean = jnp.sum(y, axis=0, keepdims=True) * inv_m
    var = jnp.maximum(jnp.sum(y * y, axis=0, keepdims=True) * inv_m
                      - mean * mean, 0.0)
    scale = gamma_ref[...] * jax.lax.rsqrt(var + EPS)
    shift = beta_ref[...] - mean * scale
    h = jnp.maximum(y * scale + shift, 0.0)
    z_ref[...] = jnp.dot(h.astype(jnp.bfloat16), w2_ref[...],
                         preferred_element_type=jnp.float32)


def fused_forward(x_p, w1_p, gamma_p, beta_p, w2_p, *, m_real):
    Mp, Cin_p = x_p.shape
    Cout_p = w1_p.shape[1]
    Nk = w2_p.shape[1]
    kern = functools.partial(_fused_kernel, m_real=m_real)
    return pl.pallas_call(
        kern,
        grid=(1,),
        in_specs=[
            pl.BlockSpec((Mp, Cin_p), lambda i: (0, 0)),
            pl.BlockSpec((Cin_p, Cout_p), lambda i: (0, 0)),
            pl.BlockSpec((1, Cout_p), lambda i: (0, 0)),
            pl.BlockSpec((1, Cout_p), lambda i: (0, 0)),
            pl.BlockSpec((Cout_p, Nk), lambda i: (0, 0)),
        ],
        out_specs=pl.BlockSpec((Mp, Nk), lambda i: (0, 0)),
        out_shape=jax.ShapeDtypeStruct((Mp, Nk), jnp.float32),
        compiler_params=pltpu.CompilerParams(
            dimension_semantics=("arbitrary",),
            vmem_limit_bytes=VMEM_LIMIT,
        ),
    )(x_p, w1_p, gamma_p, beta_p, w2_p)


# ---------------------------------------------------------------------------
# Two-pass path, kernel A: pointwise conv (bf16 y out) + per-tile BN partial
# sums.  Fully "parallel" (no resident accumulator) -> megacore on v7x.
# ---------------------------------------------------------------------------
def _pw_conv_stats_kernel(x_ref, w_ref, y_ref, stats_ref):
    y = jnp.dot(x_ref[...], w_ref[...], preferred_element_type=jnp.float32)
    y_ref[...] = y.astype(y_ref.dtype)                  # bf16 intermediate
    s = jnp.sum(y, axis=0, keepdims=True)               # (1, Cout_p)
    ss = jnp.sum(y * y, axis=0, keepdims=True)          # (1, Cout_p)
    row = jax.lax.broadcasted_iota(jnp.int32, (8, 1), 0)
    tile = jnp.where(row == 0, s, 0.0) + jnp.where(row == 1, ss, 0.0)
    stats_ref[...] = tile[None]                         # row0=sum, row1=sumsq


def pointwise_conv_with_stats(x_p, w_p, *, tm):
    Mp, Cin_p = x_p.shape
    Cout_p = w_p.shape[1]
    nt = Mp // tm
    return pl.pallas_call(
        _pw_conv_stats_kernel,
        grid=(nt,),
        in_specs=[
            pl.BlockSpec((tm, Cin_p), lambda i: (i, 0)),
            pl.BlockSpec((Cin_p, Cout_p), lambda i: (0, 0)),
        ],
        out_specs=(
            pl.BlockSpec((tm, Cout_p), lambda i: (i, 0)),
            pl.BlockSpec((1, 8, Cout_p), lambda i: (i, 0, 0)),
        ),
        out_shape=(
            jax.ShapeDtypeStruct((Mp, Cout_p), jnp.bfloat16),
            jax.ShapeDtypeStruct((nt, 8, Cout_p), jnp.float32),
        ),
        compiler_params=pltpu.CompilerParams(
            dimension_semantics=("parallel",),
            vmem_limit_bytes=VMEM_LIMIT,
        ),
    )(x_p, w_p)


# ---------------------------------------------------------------------------
# Two-pass path, kernel B: fused BN-apply + ReLU + all-tap tconv matmul
# (lane-dense 128-wide z output).
# ---------------------------------------------------------------------------
def _bn_relu_tconv_kernel(y_ref, scale_ref, shift_ref, w2_ref, z_ref):
    h = jnp.maximum(
        y_ref[...].astype(jnp.float32) * scale_ref[...] + shift_ref[...], 0.0)
    z_ref[...] = jnp.dot(h.astype(jnp.bfloat16), w2_ref[...],
                         preferred_element_type=jnp.float32)


def bn_relu_transposed_matmul(y, scale, shift, w2_p, *, tm):
    Mp, Cout_p = y.shape
    Nk = w2_p.shape[1]
    return pl.pallas_call(
        _bn_relu_tconv_kernel,
        grid=(Mp // tm,),
        in_specs=[
            pl.BlockSpec((tm, Cout_p), lambda i: (i, 0)),
            pl.BlockSpec((1, Cout_p), lambda i: (0, 0)),
            pl.BlockSpec((1, Cout_p), lambda i: (0, 0)),
            pl.BlockSpec((Cout_p, Nk), lambda i: (0, 0)),
        ],
        out_specs=pl.BlockSpec((tm, Nk), lambda i: (i, 0)),
        out_shape=jax.ShapeDtypeStruct((Mp, Nk), jnp.float32),
        compiler_params=pltpu.CompilerParams(
            dimension_semantics=("parallel",),
            vmem_limit_bytes=VMEM_LIMIT,
        ),
    )(y, scale, shift, w2_p)


# ---------------------------------------------------------------------------
# Forward (layout glue in JAX, compute in the Pallas kernels)
# ---------------------------------------------------------------------------
def _pad_len_nlc(x, left, right):
    # F.pad semantics on the length axis (negative pads crop).
    if left < 0:
        x = x[:, -left:, :]
        left = 0
    if right < 0:
        x = x[:, : x.shape[1] + right, :]
        right = 0
    if left or right:
        x = jnp.pad(x, ((0, 0), (left, right), (0, 0)))
    return x


def last_trcnn_forward(params, x1_ncl, x2_ncl, *, kernel_size, stride,
                       force_two_pass=False):
    k, s = kernel_size, stride
    p = s // 2

    # NCL -> NLC so channels map to TPU lanes.
    x1 = jnp.transpose(x1_ncl, (0, 2, 1)).astype(jnp.float32)
    x2 = jnp.transpose(x2_ncl, (0, 2, 1)).astype(jnp.float32)

    diff = x2.shape[1] - x1.shape[1]
    x1 = _pad_len_nlc(x1, diff // 2, diff - diff // 2)
    x = jnp.concatenate([x1, x2], axis=-1)               # (N, L, Cin)
    N, L, Cin = x.shape

    w1 = params['cv_w']                                   # (Cout, Cin, 1)
    gamma, beta = params['bn_g'], params['bn_b']          # (Cout,)
    w2, b2 = params['ct_w'], params['ct_b']               # (Cout, Cout, k), (Cout,)
    Cout = w1.shape[0]
    # params['cv_b'] is intentionally unused: a constant per-channel shift is
    # exactly cancelled by the following batch-statistics BatchNorm.

    Cin_p = _round_up(Cin, 128)
    Cout_p = _round_up(Cout, 128)
    Nk = _round_up(k * Cout, 128)                         # dense tap*channel lanes
    M = N * L

    use_fused = (not force_two_pass) and (_round_up(M, 8) <= FUSED_MAX_ROWS)
    tm = _round_up(M, 8) if use_fused else _choose_tile(M, target=1024)
    Mp = _round_up(M, tm)

    # ---- operand packing (pure layout glue) ------------------------------
    x_p = jnp.zeros((Mp, Cin_p), jnp.bfloat16).at[:M, :Cin].set(
        x.reshape(M, Cin).astype(jnp.bfloat16))
    w1_p = jnp.zeros((Cin_p, Cout_p), jnp.bfloat16).at[:Cin, :Cout].set(
        w1[:, :, 0].T.astype(jnp.bfloat16))
    gamma_p = jnp.zeros((1, Cout_p), jnp.float32).at[0, :Cout].set(gamma)
    beta_p = jnp.zeros((1, Cout_p), jnp.float32).at[0, :Cout].set(beta)
    # ConvTranspose1d weight: column t*Cout + co holds w2[:, co, t].
    w2_flat = jnp.transpose(w2, (0, 2, 1)).reshape(Cout, k * Cout)
    w2_p = jnp.zeros((Cout_p, Nk), jnp.float32).at[:Cout, :k * Cout].set(
        w2_flat).astype(jnp.bfloat16)

    if use_fused:
        z = fused_forward(x_p, w1_p, gamma_p, beta_p, w2_p, m_real=M)
    else:
        y, stats = pointwise_conv_with_stats(x_p, w1_p, tm=tm)
        # Tiny tile-reduction + mean/var finalize (nt x 128 floats) in JAX.
        ssum = jnp.sum(stats[:, 0, :], axis=0, keepdims=True)   # (1, Cout_p)
        ssq = jnp.sum(stats[:, 1, :], axis=0, keepdims=True)
        mean = ssum / M
        var = jnp.maximum(ssq / M - mean * mean, 0.0)
        scale = gamma_p * jax.lax.rsqrt(var + EPS)
        shift = beta_p - mean * scale
        z = bn_relu_transposed_matmul(y, scale, shift, w2_p, tm=tm)

    # ---- overlap-add interleave of the k taps (real channels only) -------
    # TODO(synk): the strided scatter-add interleave stays in plain JAX as
    # layout glue; all matmul work already happened inside the kernels.
    zc = z[:M].reshape(N, L, Nk)
    L_full = (L - 1) * s + k
    out_full = jnp.zeros((N, L_full, Cout), jnp.float32)
    for t in range(k):
        out_full = out_full.at[:, t: t + (L - 1) * s + 1: s, :].add(
            zc[:, :, t * Cout:(t + 1) * Cout])
    Lout = (L - 1) * s - 2 * p + k
    out = out_full[:, p: p + Lout, :] + b2.reshape(1, 1, Cout)
    return jnp.transpose(out, (0, 2, 1))                  # NLC -> NCL


# ---------------------------------------------------------------------------
# Pure-JAX f32 reference (mirrors the PyTorch module, training-mode BN)
# ---------------------------------------------------------------------------
def _reference_forward(params, x1_ncl, x2_ncl, *, kernel_size, stride):
    k, s = kernel_size, stride
    p = s // 2
    diff = x2_ncl.shape[2] - x1_ncl.shape[2]
    x1 = jnp.pad(x1_ncl, ((0, 0), (0, 0), (diff // 2, diff - diff // 2)))
    x = jnp.concatenate([x1, x2_ncl], axis=1)             # (N, Cin, L)
    w1, b1 = params['cv_w'][:, :, 0], params['cv_b']
    y = jnp.einsum('ncl,oc->nol', x, w1) + b1[None, :, None]
    mean = jnp.mean(y, axis=(0, 2), keepdims=True)
    var = jnp.var(y, axis=(0, 2), keepdims=True)
    h = (y - mean) * jax.lax.rsqrt(var + EPS)
    h = h * params['bn_g'][None, :, None] + params['bn_b'][None, :, None]
    h = jnp.maximum(h, 0.0)
    w2, b2 = params['ct_w'], params['ct_b']
    N, _, L = h.shape
    Cout = w2.shape[1]
    L_full = (L - 1) * s + k
    out = jnp.zeros((N, Cout, L_full), jnp.float32)
    for t in range(k):
        out = out.at[:, :, t: t + (L - 1) * s + 1: s].add(
            jnp.einsum('ncl,co->nol', h, w2[:, :, t]))
    Lout = (L - 1) * s - 2 * p + k
    return out[:, :, p: p + Lout] + b2[None, :, None]


# ---------------------------------------------------------------------------
# Deterministic parameter construction (matches nn.Module shapes)
# ---------------------------------------------------------------------------
def make_params(key, in_ch, out_ch, k):
    k1, k2, k3, k4 = jax.random.split(key, 4)
    bnd1 = (in_ch * 1) ** -0.5
    bnd2 = (out_ch * k) ** -0.5
    return {
        'cv_w': jax.random.uniform(k1, (out_ch, in_ch, 1), jnp.float32, -bnd1, bnd1),
        'cv_b': jax.random.uniform(k2, (out_ch,), jnp.float32, -bnd1, bnd1),
        'bn_g': jnp.ones((out_ch,), jnp.float32),
        'bn_b': jnp.zeros((out_ch,), jnp.float32),
        'ct_w': jax.random.uniform(k3, (out_ch, out_ch, k), jnp.float32, -bnd2, bnd2),
        'ct_b': jax.random.uniform(k4, (out_ch,), jnp.float32, -bnd2, bnd2),
    }


if __name__ == "__main__":
    # LastTrCNN(in_channels=128, out_channels=5, kernel_size=5, stride=2),
    # as used in trunet.py (x1 and x2 each carry 64 channels).
    IN_CH, OUT_CH, K, S = 128, 5, 5, 2
    root = jax.random.PRNGKey(0)
    pkey, xk1, xk2 = jax.random.split(root, 3)
    params = make_params(pkey, IN_CH, OUT_CH, K)

    # PyTorch-style NCL inputs; x1 is shorter and gets length-padded in forward.
    x1 = jax.random.normal(xk1, (2, 64, 30), dtype=jnp.float32)
    x2 = jax.random.normal(xk2, (2, 64, 32), dtype=jnp.float32)

    fwd_fused = jax.jit(functools.partial(
        last_trcnn_forward, kernel_size=K, stride=S, force_two_pass=False))
    fwd_2pass = jax.jit(functools.partial(
        last_trcnn_forward, kernel_size=K, stride=S, force_two_pass=True))

    y_fused = jax.block_until_ready(fwd_fused(params, x1, x2))
    y_2pass = jax.block_until_ready(fwd_2pass(params, x1, x2))
    y_ref = _reference_forward(params, x1, x2, kernel_size=K, stride=S)

    Lout = (x2.shape[2] - 1) * S - 2 * (S // 2) + K        # 65
    assert y_fused.shape == (2, OUT_CH, Lout), y_fused.shape
    assert y_2pass.shape == (2, OUT_CH, Lout), y_2pass.shape
    assert bool(jnp.all(jnp.isfinite(y_fused)))
    assert bool(jnp.all(jnp.isfinite(y_2pass)))
    # bf16 MXU operands -> loose tolerance vs. the f32 reference.
    assert float(jnp.max(jnp.abs(y_fused - y_ref))) < 1e-1
    assert float(jnp.max(jnp.abs(y_2pass - y_ref))) < 1e-1
    print("KERNEL_OK")
</pallas_src>

<mosaic_0001>
module attributes {stable_mosaic.version = 11 : i64} {
  func.func @_fused_kernel(%arg0: i32, %arg1: memref<64x128xbf16, #tpu.memory_space<vmem>>, %arg2: memref<128x128xbf16, #tpu.memory_space<vmem>>, %arg3: memref<1x128xf32, #tpu.memory_space<vmem>>, %arg4: memref<1x128xf32, #tpu.memory_space<vmem>>, %arg5: memref<128x128xbf16, #tpu.memory_space<vmem>>, %arg6: memref<64x128xf32, #tpu.memory_space<vmem>>) attributes {dimension_semantics = [#tpu.dimension_semantics<arbitrary>], iteration_bounds = array<i64: 1>, scalar_prefetch = 0 : i64, scratch_operands = 0 : i64, tpu.core_type = #tpu.core_type<tc>, window_params = [{pipeline_mode = #tpu.pipeline_mode<synchronous>, transform_indices = @transform_0, window_bounds = array<i64: 64, 128>}, {pipeline_mode = #tpu.pipeline_mode<synchronous>, transform_indices = @transform_1, window_bounds = array<i64: 128, 128>}, {pipeline_mode = #tpu.pipeline_mode<synchronous>, transform_indices = @transform_2, window_bounds = array<i64: 1, 128>}, {pipeline_mode = #tpu.pipeline_mode<synchronous>, transform_indices = @transform_3, window_bounds = array<i64: 1, 128>}, {pipeline_mode = #tpu.pipeline_mode<synchronous>, transform_indices = @transform_4, window_bounds = array<i64: 128, 128>}, {pipeline_mode = #tpu.pipeline_mode<synchronous>, transform_indices = @transform_5, window_bounds = array<i64: 64, 128>}]} {
    %c0 = arith.constant 0 : index
    %c0_0 = arith.constant 0 : index
    %0 = vector.load %arg1[%c0, %c0_0] : memref<64x128xbf16, #tpu.memory_space<vmem>>, vector<64x128xbf16>
    %c0_1 = arith.constant 0 : index
    %c0_2 = arith.constant 0 : index
    %1 = vector.load %arg2[%c0_1, %c0_2] : memref<128x128xbf16, #tpu.memory_space<vmem>>, vector<128x128xbf16>
    %cst = arith.constant dense<0.000000e+00> : vector<64x128xf32>
    %2 = tpu.matmul %0, %1, %cst {dimension_numbers = #tpu.dot_dimension_numbers<[1], [0], [0], [1], [0, 0, 1, 1], [], []>} : vector<64x128xbf16>, vector<128x128xbf16>, vector<64x128xf32> -> vector<64x128xf32>
    %cst_3 = arith.constant dense<0.000000e+00> : vector<128xf32>
    %3 = vector.multi_reduction <add>, %2, %cst_3 [0] : vector<64x128xf32> to vector<128xf32>
    %4 = vector.shape_cast %3 : vector<128xf32> to vector<1x128xf32>
    %cst_4 = arith.constant 1.562500e-02 : f32
    %5 = vector.broadcast %cst_4 : f32 to vector<1x128xf32>
    %6 = arith.mulf %4, %5 : vector<1x128xf32>
    %7 = arith.mulf %2, %2 : vector<64x128xf32>
    %cst_5 = arith.constant dense<0.000000e+00> : vector<128xf32>
    %8 = vector.multi_reduction <add>, %7, %cst_5 [0] : vector<64x128xf32> to vector<128xf32>
    %9 = vector.shape_cast %8 : vector<128xf32> to vector<1x128xf32>
    %cst_6 = arith.constant 1.562500e-02 : f32
    %10 = vector.broadcast %cst_6 : f32 to vector<1x128xf32>
    %11 = arith.mulf %9, %10 : vector<1x128xf32>
    %12 = arith.mulf %6, %6 : vector<1x128xf32>
    %13 = arith.subf %11, %12 : vector<1x128xf32>
    %cst_7 = arith.constant 0.000000e+00 : f32
    %14 = vector.broadcast %cst_7 : f32 to vector<1x128xf32>
    %15 = arith.maximumf %13, %14 : vector<1x128xf32>
    %c0_8 = arith.constant 0 : index
    %c0_9 = arith.constant 0 : index
    %16 = vector.load %arg3[%c0_8, %c0_9] : memref<1x128xf32, #tpu.memory_space<vmem>>, vector<1x128xf32>
    %cst_10 = arith.constant 9.99999974E-6 : f32
    %17 = vector.broadcast %cst_10 : f32 to vector<1x128xf32>
    %18 = arith.addf %15, %17 : vector<1x128xf32>
    %19 = math.rsqrt %18 : vector<1x128xf32>
    %20 = arith.mulf %16, %19 : vector<1x128xf32>
    %c0_11 = arith.constant 0 : index
    %c0_12 = arith.constant 0 : index
    %21 = vector.load %arg4[%c0_11, %c0_12] : memref<1x128xf32, #tpu.memory_space<vmem>>, vector<1x128xf32>
    %22 = arith.mulf %6, %20 : vector<1x128xf32>
    %23 = arith.subf %21, %22 : vector<1x128xf32>
    %24 = vector.broadcast %20 : vector<1x128xf32> to vector<64x128xf32>
    %25 = arith.mulf %2, %24 : vector<64x128xf32>
    %26 = vector.broadcast %23 : vector<1x128xf32> to vector<64x128xf32>
    %27 = arith.addf %25, %26 : vector<64x128xf32>
    %cst_13 = arith.constant 0.000000e+00 : f32
    %28 = vector.broadcast %cst_13 : f32 to vector<64x128xf32>
    %29 = arith.maximumf %27, %28 : vector<64x128xf32>
    %30 = arith.truncf %29 : vector<64x128xf32> to vector<64x128xbf16>
    %c0_14 = arith.constant 0 : index
    %c0_15 = arith.constant 0 : index
    %31 = vector.load %arg5[%c0_14, %c0_15] : memref<128x128xbf16, #tpu.memory_space<vmem>>, vector<128x128xbf16>
    %cst_16 = arith.constant dense<0.000000e+00> : vector<64x128xf32>
    %32 = tpu.matmul %30, %31, %cst_16 {dimension_numbers = #tpu.dot_dimension_numbers<[1], [0], [0], [1], [0, 0, 1, 1], [], []>} : vector<64x128xbf16>, vector<128x128xbf16>, vector<64x128xf32> -> vector<64x128xf32>
    %c0_17 = arith.constant 0 : index
    %c0_18 = arith.constant 0 : index
    %33 = vector.load %arg6[%c0_17, %c0_18] : memref<64x128xf32, #tpu.memory_space<vmem>>, vector<64x128xf32>
    tpu.vector_store %arg6[%c0_17, %c0_18], %32 {strides = array<i32>} : memref<64x128xf32, #tpu.memory_space<vmem>>, vector<64x128xf32>,
    return
  }
  func.func @transform_0(%arg0: i32) -> (i32, i32) {
    %c0_i32 = arith.constant 0 : i32
    %c0_i32_0 = arith.constant 0 : i32
    %c0_i32_1 = arith.constant 0 : i32
    return %c0_i32, %c0_i32_0 : i32, i32
  }
  func.func @transform_1(%arg0: i32) -> (i32, i32) {
    %c0_i32 = arith.constant 0 : i32
    %c0_i32_0 = arith.constant 0 : i32
    %c0_i32_1 = arith.constant 0 : i32
    return %c0_i32, %c0_i32_0 : i32, i32
  }
  func.func @transform_2(%arg0: i32) -> (i32, i32) {
    %c0_i32 = arith.constant 0 : i32
    %c0_i32_0 = arith.constant 0 : i32
    %c0_i32_1 = arith.constant 0 : i32
    return %c0_i32, %c0_i32_0 : i32, i32
  }
  func.func @transform_3(%arg0: i32) -> (i32, i32) {
    %c0_i32 = arith.constant 0 : i32
    %c0_i32_0 = arith.constant 0 : i32
    %c0_i32_1 = arith.constant 0 : i32
    return %c0_i32, %c0_i32_0 : i32, i32
  }
  func.func @transform_4(%arg0: i32) -> (i32, i32) {
    %c0_i32 = arith.constant 0 : i32
    %c0_i32_0 = arith.constant 0 : i32
    %c0_i32_1 = arith.constant 0 : i32
    return %c0_i32, %c0_i32_0 : i32, i32
  }
  func.func @transform_5(%arg0: i32) -> (i32, i32) {
    %c0_i32 = arith.constant 0 : i32
    %c0_i32_0 = arith.constant 0 : i32
    %c0_i32_1 = arith.constant 0 : i32
    return %c0_i32, %c0_i32_0 : i32, i32
  }
}

</mosaic_0001>

<bundles_post_ra>
// kernel: last_trcnn_forward.1
= control target key start
LH: loop header
LB: loop body
LE: loop exit
PB: predicated region body
PF: predicated region fallthrough
CT: control target
= control target key end

     0   :  { %s667_s1 = inlined_call_operand.vmem [shape: bf16[128,128], index: 1, kind: input, shape index: {}]   ;;  %s668_s0 = inlined_call_operand.vmem [shape: bf16[64,128], index: 0, kind: input, shape index: {}]   ;;  %s669_s4 = inlined_call_operand.vmem [shape: bf16[128,128], index: 4, kind: input, shape index: {}]   ;;  %s670_s2 = inlined_call_operand.vmem [shape: f32[1,128], index: 2, kind: input, shape index: {}]   ;;  %s671_s3 = inlined_call_operand.vmem [shape: f32[1,128], index: 3, kind: input, shape index: {}]   ;;  %s672_s5 = inlined_call_operand.vmem [shape: f32[64,128], index: 5, kind: output, shape index: {}]  }
   0x1   :  { %v501_v0 = vld [vmem:[%s667_s1 + $0x38] sm:$0xff]   ;;  %v502_v1 = vld [vmem:[%s667_s1 + $0x30] sm:$0xff]   ;;  %v503_v2 = vld [vmem:[%s667_s1 + $0x28] sm:$0xff]  }
   0x2   :  { %453 = vmatprep.subr.bf16.mxu0 %v501_v0  ;;  %v504_v3 = vld [vmem:[%s667_s1 + $0x20] sm:$0xff]   ;;  %v505_v5 = vld [vmem:[%s667_s1 + $0x18] sm:$0xff]   ;;  %v506_v6 = vld [vmem:[%s667_s1 + $0x10] sm:$0xff]  }
   0x3   :  { %454 = vmatpush3.bf16.msra.mxu0 %v501_v0  ;;  %v509_v4 = vld [vmem:[%s668_s0] sm:$0xff]   ;;  %v507_v7 = vld [vmem:[%s667_s1 + $0x8] sm:$0xff]   ;;  %v511_v10 = vld [vmem:[%s668_s0 + $0x10] sm:$0xff]  }
   0x4   :  { %455 = vmatprep.subr.bf16.mxu0 %v502_v1  ;;  %469 = vmatprep.mubr.bf16.mxu0 %v509_v4  ;;  %v508_v8 = vld [vmem:[%s667_s1] sm:$0xff]   ;;  %v510_v9 = vld [vmem:[%s668_s0 + $0x8] sm:$0xff]   ;;  %v512_v11 = vld [vmem:[%s668_s0 + $0x18] sm:$0xff]   ;;  %v229_v4 = vlaneseq }
   0x5   :  { %v513_v12 = vld [vmem:[%s669_s4 + $0x38] sm:$0xff]   ;;  %v514_v13 = vld [vmem:[%s669_s4 + $0x30] sm:$0xff]   ;;  %v515_v14 = vld [vmem:[%s669_s4 + $0x28] sm:$0xff]  }
   0x6   :  { %477 = vmatprep.subr.bf16.mxu1 %v513_v12  ;;  %v516_v15 = vld [vmem:[%s669_s4 + $0x20] sm:$0xff]   ;;  %v517_v16 = vld [vmem:[%s669_s4 + $0x18] sm:$0xff]   ;;  %v518_v17 = vld [vmem:[%s669_s4 + $0x10] sm:$0xff]  }
   0x7   :  { %456 = vmatpush3.bf16.msra.mxu0 %v502_v1  ;;  %478 = vmatpush3.bf16.msra.mxu1 %v513_v12  ;;  %v519_v18 = vld [vmem:[%s669_s4 + $0x8] sm:$0xff]   ;;  %v520_v19 = vld [vmem:[%s669_s4] sm:$0xff]  }
   0x8   :  { %457 = vmatprep.subr.bf16.mxu0 %v503_v2  ;;  %479 = vmatprep.subr.bf16.mxu1 %v514_v13 }
   0xb   :  { %458 = vmatpush3.bf16.msra.mxu0 %v503_v2  ;;  %480 = vmatpush3.bf16.msra.mxu1 %v514_v13 }
   0xc   :  { %459 = vmatprep.subr.bf16.mxu0 %v504_v3  ;;  %481 = vmatprep.subr.bf16.mxu1 %v515_v14 }
   0xf   :  { %460 = vmatpush3.bf16.msra.mxu0 %v504_v3  ;;  %482 = vmatpush3.bf16.msra.mxu1 %v515_v14 }
  0x10   :  { %461 = vmatprep.subr.bf16.mxu0 %v505_v5  ;;  %483 = vmatprep.subr.bf16.mxu1 %v516_v15 }
  0x13   :  { %462 = vmatpush3.bf16.msra.mxu0 %v505_v5  ;;  %484 = vmatpush3.bf16.msra.mxu1 %v516_v15  ;;  %v230_v5 = vshrl.u32 %v229_v4, 7 }
  0x14   :  { %463 = vmatprep.subr.bf16.mxu0 %v506_v6  ;;  %485 = vmatprep.subr.bf16.mxu1 %v517_v16 }
  0x17   :  { %464 = vmatpush3.bf16.msra.mxu0 %v506_v6  ;;  %486 = vmatpush3.bf16.msra.mxu1 %v517_v16  ;;  %v221_v6 = vld [vmem:[%s670_s2] sm:$0x1] }
  0x18   :  { %465 = vmatprep.subr.bf16.mxu0 %v507_v7  ;;  %487 = vmatprep.subr.bf16.mxu1 %v518_v17 }
  0x1b   :  { %466 = vmatpush3.bf16.msra.mxu0 %v507_v7  ;;  %488 = vmatpush3.bf16.msra.mxu1 %v518_v17  ;;  %v231_v7 = vsub.s32 0, %v230_v5 }
  0x1c   :  { %467 = vmatprep.subr.bf16.mxu0 %v508_v8  ;;  %489 = vmatprep.subr.bf16.mxu1 %v519_v18 }
  0x1f   :  { %468 = vmatpush3.bf16.msra.mxu0 %v508_v8  ;;  %490 = vmatpush3.bf16.msra.mxu1 %v519_v18 }
  0x20   :  { %491 = vmatprep.subr.bf16.mxu1 %v520_v19 }
  0x22   :  { %470 = vmatmul.mubr.bf16.vlgmr.msra.gmra.mxu0 %v510_v9 }
  0x23   :  { %473 = vmatprep.mubr.bf16.mxu0 %v511_v10  ;;  %492 = vmatpush3.bf16.msra.mxu1 %v520_v19  ;;  %v225_v10 = vld [vmem:[%s671_s3] sm:$0x1] }
  0x2a   :  { %474 = vmatmul.mubr.bf16.gmra.mxu0 %v512_v11 }
  0xe2   :  { %v613_v20 = vpop.f32.mrf.mxu0 }
  0xe3   :  { %v198_v28 = vmul.f32 %v613_v20, %v613_v20 }
  0xe4   :  { %v151_v21 = vpop.f32.mrf.mxu0 }
  0xe5   :  { %v196_v24 = vmul.f32 %v151_v21, %v151_v21 }
  0xe6   :  { %v615_v22 = vpop.f32.mrf.mxu0 }
  0xe7   :  { %v199_v32 = vmul.f32 %v615_v22, %v615_v22 }
  0xe8   :  { %v154_v23 = vpop.f32.mrf.mxu0 }
  0xe9   :  { %v182_v25 = vadd.f32 %v154_v23, %v151_v21  ;;  %v197_v26 = vmul.f32 %v154_v23, %v154_v23 }
  0xea   :  { %v617_v27 = vpop.f32.mrf.mxu0 }
  0xeb   :  { %v183_v29 = vadd.f32 %v613_v20, %v182_v25  ;;  %v204_v30 = vadd.f32 %v197_v26, %v196_v24  ;;  %v202_v43 = vmul.f32 %v617_v27, %v617_v27 }
  0xec   :  { %v167_v31 = vpop.f32.mrf.mxu0 }
  0xed   :  { %v205_v33 = vadd.f32 %v204_v30, %v198_v28  ;;  %v184_v34 = vadd.f32 %v615_v22, %v183_v29  ;;  %v200_v37 = vmul.f32 %v167_v31, %v167_v31 }
  0xee   :  { %v625_v35 = vpop.f32.mrf.mxu0 }
  0xef   :  { %v185_v36 = vadd.f32 %v184_v34, %v167_v31  ;;  %v206_v38 = vadd.f32 %v205_v33, %v199_v32  ;;  %v203_v46 = vmul.f32 %v625_v35, %v625_v35 }
  0xf0   :  { %v170_v39 = vpop.f32.mrf.mxu0 }
  0xf1   :  { %v207_v40 = vadd.f32 %v206_v38, %v200_v37  ;;  %v186_v41 = vadd.f32 %v185_v36, %v170_v39  ;;  %v201_v42 = vmul.f32 %v170_v39, %v170_v39 }
  0xf3   :  { %v187_v44 = vadd.f32 %v617_v27, %v186_v41  ;;  %v208_v45 = vadd.f32 %v207_v40, %v201_v42 }
  0xf5   :  { %v188_v47 = vadd.f32 %v625_v35, %v187_v44  ;;  %v209_v48 = vadd.f32 %v208_v45, %v202_v43 }
  0xf7   :  { %v189_v49 = vrot.slane %v188_v47, 4  ;;  %v210_v50 = vadd.f32 %v209_v48, %v203_v46 }
  0xf9   :  { %v190_v51 = vadd.f32 %v189_v49, %v188_v47  ;;  %v211_v52 = vrot.slane %v210_v50, 4 }
  0xfb   :  { %v191_v53 = vrot.slane %v190_v51, 2  ;;  %v212_v54 = vadd.f32 %v211_v52, %v210_v50 }
  0xfd   :  { %v192_v55 = vadd.f32 %v191_v53, %v190_v51  ;;  %v213_v56 = vrot.slane %v212_v54, 2 }
  0xff   :  { %v193_v57 = vrot.slane %v192_v55, 1  ;;  %v214_v58 = vadd.f32 %v213_v56, %v212_v54 }
 0x101   :  { %v194_v59 = vadd.f32 %v193_v57, %v192_v55  ;;  %v215_v60 = vrot.slane %v214_v58, 1 }
 0x103   :  { %v195_v61 = vmul.f32 0.015625, %v194_v59  ;;  %v216_v62 = vadd.f32 %v215_v60, %v214_v58 }
 0x105   :  { %v217_v63 = vmul.f32 0.015625, %v216_v62  ;;  %v218_v0 = vmul.f32 %v195_v61, %v195_v61 }
 0x107   :  { %v219_v1 = vsub.f32 %v217_v63, %v218_v0 }
 0x109   :  { %v220_v2 = vmax.f32 %v219_v1, 0.0 }
 0x10b   :  { %v222_v3 = vadd.f32 1e-05, %v220_v2 }
 0x10d   :  { %521 = vrsqrt.f32 %v222_v3 }
 0x11a   :  { %v522_v8 = vpop.eup %521 }
 0x11b   :  { %v224_v9 = vmul.f32 %v522_v8, %v221_v6 }
 0x11d   :  { %v226_v11 = vmul.f32 %v224_v9, %v195_v61  ;;  %v232_v12 = vrot.slane %v224_v9, %v231_v7 }
 0x11f   :  { %v227_v13 = vsub.f32 %v225_v10, %v226_v11  ;;  %v239_v14 = vmul.f32 %v232_v12, %v170_v39  ;;  %v234_v16 = vmul.f32 %v232_v12, %v151_v21  ;;  %v235_v17 = vmul.f32 %v232_v12, %v154_v23 }
 0x120   :  { %v236_v18 = vmul.f32 %v613_v20, %v232_v12  ;;  %v237_v19 = vmul.f32 %v615_v22, %v232_v12  ;;  %v238_v24 = vmul.f32 %v232_v12, %v167_v31  ;;  %v240_v21 = vmul.f32 %v617_v27, %v232_v12 }
 0x121   :  { %v246_v15 = vrot.slane %v227_v13, %v231_v7  ;;  %v241_v23 = vmul.f32 %v625_v35, %v232_v12 }
 0x123   :  { %v253_v25 = vadd.f32 %v246_v15, %v239_v14  ;;  %v248_v26 = vadd.f32 %v246_v15, %v234_v16  ;;  %v249_v28 = vadd.f32 %v246_v15, %v235_v17  ;;  %v250_v29 = vadd.f32 %v246_v15, %v236_v18 }
 0x124   :  { %v251_v30 = vadd.f32 %v246_v15, %v237_v19  ;;  %v252_v32 = vadd.f32 %v246_v15, %v238_v24  ;;  %v254_v22 = vadd.f32 %v246_v15, %v240_v21  ;;  %v255_v31 = vadd.f32 %v246_v15, %v241_v23 }
 0x125   :  { %v261_v33 = vmax.f32 %v253_v25, 0.0  ;;  %v256_v34 = vmax.f32 %v248_v26, 0.0  ;;  %v257_v36 = vmax.f32 %v249_v28, 0.0  ;;  %v258_v37 = vmax.f32 %v250_v29, 0.0 }
 0x126   :  { %v259_v38 = vmax.f32 %v251_v30, 0.0  ;;  %v260_v39 = vmax.f32 %v252_v32, 0.0  ;;  %v262_v42 = vmax.f32 %v254_v22, 0.0  ;;  %v263_v43 = vmax.f32 %v255_v31, 0.0 }
 0x127   :  { %v264_v20 = vpack.c.bf16 %v257_v36, %v256_v34 }
 0x128   :  { %v265_v40 = vpack.c.bf16 %v259_v38, %v258_v37  ;;  %v266_v41 = vpack.c.bf16 %v261_v33, %v260_v39  ;;  %v267_v44 = vpack.c.bf16 %v263_v43, %v262_v42 }
 0x129   :  { %493 = vmatprep.mubr.bf16.mxu1 %v264_v20 }
 0x12a   :  { %494 = vmatmul.mubr.bf16.vlgmr.msra.gmra.mxu1 %v265_v40 }
 0x12b   :  { %497 = vmatprep.mubr.bf16.mxu1 %v266_v41 }
 0x132   :  { %498 = vmatmul.mubr.bf16.gmra.mxu1 %v267_v44 }
 0x1ea   :  { %v495_v45 = vpop.f32.mrf.mxu1 }
 0x1eb   :  { %399 = vst [vmem:[%s672_s5 + $0x10] sm:$0xff] %v495_v45 }
 0x1ec   :  { %v366_v27 = vpop.f32.mrf.mxu1 }
 0x1ed   :  { %397 = vst [vmem:[%s672_s5] sm:$0xff] %v366_v27 }
 0x1ee   :  { %v496_v35 = vpop.f32.mrf.mxu1 }
 0x1ef   :  { %400 = vst [vmem:[%s672_s5 + $0x18] sm:$0xff] %v496_v35 }
 0x1f0   :  { %v369_v46 = vpop.f32.mrf.mxu1 }
 0x1f1   :  { %398 = vst [vmem:[%s672_s5 + $0x8] sm:$0xff] %v369_v46 }
 0x1f2   :  { %v499_v47 = vpop.f32.mrf.mxu1 }
 0x1f3   :  { %403 = vst [vmem:[%s672_s5 + $0x30] sm:$0xff] %v499_v47 }
 0x1f4   :  { %v382_v48 = vpop.f32.mrf.mxu1 }
 0x1f5   :  { %401 = vst [vmem:[%s672_s5 + $0x20] sm:$0xff] %v382_v48 }
 0x1f6   :  { %v500_v49 = vpop.f32.mrf.mxu1 }
 0x1f7   :  { %404 = vst [vmem:[%s672_s5 + $0x38] sm:$0xff] %v500_v49 }
 0x1f8   :  { %v385_v50 = vpop.f32.mrf.mxu1 }
 0x1f9   :  { %402 = vst [vmem:[%s672_s5 + $0x28] sm:$0xff] %v385_v50 }

</bundles_post_ra>
